<compile_context>
chip_gen: v7x
topology: tpu7x:2x2x1
jax: 0.10.0
libtpu: 0.0.40
codegen_flags: <defaults>
</compile_context>

<pallas_src>
import functools

import jax
import jax.numpy as jnp
from jax.experimental import pallas as pl
from jax.experimental.pallas import tpu as pltpu

_BN_EPS = 1e-5


# --------------------------- Pass 1: per-image channel statistics ---------------------------
def _stats_kernel(x_ref, sum_ref, sq_ref, *, h_total):
    """Accumulate per-channel sum / sum-of-squares for one image across H tiles.

    The outputs are per-image partials (block-resident across the H grid axis) so the batch
    grid axis can be 'parallel' (both TensorCores on v7x); finalize happens outside.
    """
    h = pl.program_id(1)

    @pl.when(h == 0)
    def _():
        sum_ref[...] = jnp.zeros_like(sum_ref)
        sq_ref[...] = jnp.zeros_like(sq_ref)

    _, hi, wo, c2 = x_ref.shape
    xv = x_ref[...].astype(jnp.float32)          # upcast in-register (v5e VPU has no bf16)
    if h_total % hi != 0:                        # static check: only emit masking for ragged H
        valid = jnp.minimum(h_total - h * hi, hi)
        rows = jax.lax.broadcasted_iota(jnp.int32, xv.shape, 1)
        xv = jnp.where(rows < valid, xv, 0.0)

    xf = xv.reshape(hi * wo, c2)
    sum_ref[...] += jnp.sum(xf, axis=0, keepdims=True).reshape(sum_ref.shape)
    sq_ref[...] += jnp.sum(xf * xf, axis=0, keepdims=True).reshape(sq_ref.shape)


# ------------------- Pass 2: fused BN + ReLU + 2x2 avg-pool + 1x1 conv ----------------------
def _transition_kernel(scale_ref, shift_ref, x_ref, w_ref, o_ref, *, mm_dtype):
    # scale_ref/shift_ref: (1, 2*C_in)           BN affine, duplicated for the W-pair lanes
    # x_ref:               (1, 2*TH, Wo, 2*C_in) input tile (W-pair folded into lanes)
    # w_ref:               (2*C_in, C_out)       conv weight stacked [w; w] * 0.25
    # o_ref:               (1, TH, Wo, C_out)
    _, hi, wo, c2 = x_ref.shape
    th = hi // 2
    c_out = o_ref.shape[-1]

    scale = scale_ref[...].reshape(1, 1, 1, c2)
    shift = shift_ref[...].reshape(1, 1, 1, c2)

    # BN + ReLU in f32 (bf16 inputs upcast in-register).
    z = jnp.maximum(x_ref[...].astype(jnp.float32) * scale + shift, 0.0)

    # H-pool: free leading-dim reshape exposes the row pair; summing a major axis is plain
    # vreg adds (no scratch round-trip, no strided stores).
    zh = z.reshape(th, 2, wo, c2).sum(axis=1)                      # (TH, Wo, 2*C_in) f32

    # W-pool + 1x1 conv fused into one MXU matmul: the W-pair lives in the lane dim and the
    # stacked weight performs the pair-sum inside the contraction.  The 1/4 avg-pool factor
    # is already folded into w.
    pf = zh.reshape(th * wo, c2).astype(mm_dtype)
    out = jnp.dot(pf, w_ref[...], preferred_element_type=jnp.float32)
    o_ref[...] = out.reshape(1, th, wo, c_out).astype(o_ref.dtype)


# ----------------------------------- tiling / budgets ---------------------------------------
def _device_budgets():
    """(input-tile byte budget, scoped-VMEM limit) per TPU generation."""
    try:
        kind = jax.devices()[0].device_kind.lower()
    except Exception:  # pragma: no cover
        kind = ""
    if "v7" in kind or "7x" in kind:
        # v7x: 64 MiB physical VMEM -> keep tiles modest so double-buffering survives.
        return 4 << 20, 40 * 1024 * 1024
    # v5e / v6e: 128 MiB physical VMEM -> bigger tiles amortize per-grid-step overhead.
    return 8 << 20, 64 * 1024 * 1024


def _pick_th(Ho, W, C, itemsize, budget_bytes):
    """Output rows per tile.  Prefers a divisor of Ho (no ragged tail); otherwise falls back
    to the largest tile within budget and lets the kernels handle the masked tail."""
    per_out_row = 2 * W * C * itemsize          # bytes of input per output row
    max_th = int(max(1, min(Ho, budget_bytes // max(per_out_row, 1))))
    for th in range(max_th, 0, -1):
        if Ho % th == 0 and 4 * th >= max_th:
            return th
    return max_th


# ---------------------------------------- wrappers ------------------------------------------
def transition_forward_nhwc(x_nhwc, gamma, beta, conv_w):
    """NHWC-native Transition forward.

    x_nhwc: (N, H, W, C_in) f32 or bf16; conv_w: (C_out, C_in, 1, 1).
    Returns (N, H//2, W//2, C_out) in x's dtype.
    """
    N, H, W, C_in = x_nhwc.shape
    C_out = conv_w.shape[0]
    assert H % 2 == 0 and W % 2 == 0, "AvgPool2d(2,2): even H/W expected"
    Ho, Wo = H // 2, W // 2
    C2 = 2 * C_in

    # Keep activations in their native dtype in HBM (bf16 path halves bytes).
    x = x_nhwc
    mm_dtype = jnp.bfloat16 if x.dtype == jnp.bfloat16 else jnp.float32

    # Fold the W-pool pair into the lane axis: free bitcast-reshape of contiguous NHWC.
    xr = x.reshape(N, H, Wo, C2)

    # 1x1 conv weight, transposed, 1/4 pool factor folded in, stacked [w; w] for the W-pair.
    w1 = conv_w.reshape(C_out, C_in).T.astype(jnp.float32) * 0.25
    w2 = jnp.concatenate([w1, w1], axis=0).astype(mm_dtype)        # (2*C_in, C_out)

    budget, vmem_limit = _device_budgets()
    TH = _pick_th(Ho, W, C_in, x.dtype.itemsize, budget)
    grid = (N, pl.cdiv(Ho, TH))

    x_spec = pl.BlockSpec((1, 2 * TH, Wo, C2), lambda n, h: (n, h, 0, 0))

    # ---- Pass 1: per-image partial sums (batch axis parallel -> megacore on v7x) ----
    part_sum, part_sq = pl.pallas_call(
        functools.partial(_stats_kernel, h_total=H),
        grid=grid,
        out_shape=(jax.ShapeDtypeStruct((N, 1, C2), jnp.float32),
                   jax.ShapeDtypeStruct((N, 1, C2), jnp.float32)),
        in_specs=[x_spec],
        out_specs=(pl.BlockSpec((1, 1, C2), lambda n, h: (n, 0, 0)),
                   pl.BlockSpec((1, 1, C2), lambda n, h: (n, 0, 0))),
        compiler_params=pltpu.CompilerParams(
            dimension_semantics=("parallel", "arbitrary"),
            vmem_limit_bytes=vmem_limit),
    )(xr)

    # ---- Finalize BN affine in plain JAX on tiny arrays ----
    # TODO(synk): E[x^2]-mean^2 in f32 can cancel for very large activations/element counts;
    #             strict parity in that regime needs shifted/Welford accumulation.
    inv_m = 1.0 / float(N * H * W)
    total_sum = part_sum.reshape(N, 2, C_in).sum(axis=(0, 1))      # fold W-pair halves
    total_sq = part_sq.reshape(N, 2, C_in).sum(axis=(0, 1))
    mean = total_sum * inv_m
    var = total_sq * inv_m - mean * mean                           # biased (train-mode BN)
    scale = gamma.astype(jnp.float32) * jax.lax.rsqrt(var + _BN_EPS)
    shift = beta.astype(jnp.float32) - mean * scale
    scale2 = jnp.concatenate([scale, scale], axis=0).reshape(1, C2)
    shift2 = jnp.concatenate([shift, shift], axis=0).reshape(1, C2)

    chan_spec = pl.BlockSpec((1, C2), lambda n, h: (0, 0))

    # ---- Pass 2: fused streaming kernel; both grid axes parallel ----
    out = pl.pallas_call(
        functools.partial(_transition_kernel, mm_dtype=mm_dtype),
        grid=grid,
        out_shape=jax.ShapeDtypeStruct((N, Ho, Wo, C_out), x.dtype),
        in_specs=[chan_spec, chan_spec, x_spec,
                  pl.BlockSpec((C2, C_out), lambda n, h: (0, 0))],
        out_specs=pl.BlockSpec((1, TH, Wo, C_out), lambda n, h: (n, h, 0, 0)),
        compiler_params=pltpu.CompilerParams(
            dimension_semantics=("parallel", "parallel"),
            vmem_limit_bytes=vmem_limit),
    )(scale2, shift2, xr, w2)
    return out


def transition_forward(x_nchw, gamma, beta, conv_w):
    """NCHW convenience wrapper (PyTorch interface parity).

    For best performance keep the model NHWC end-to-end and call transition_forward_nhwc
    directly; these boundary transposes are two extra HBM passes around a memory-bound kernel.
    """
    x_nhwc = jnp.transpose(x_nchw, (0, 2, 3, 1))
    out_nhwc = transition_forward_nhwc(x_nhwc, gamma, beta, conv_w)
    return jnp.transpose(out_nhwc, (0, 3, 1, 2))


def _reference(x, gamma, beta, conv_w, eps=_BN_EPS):
    """Pure-JAX reference matching torch Transition.forward (train-mode BN), NCHW."""
    mean = jnp.mean(x, axis=(0, 2, 3), keepdims=True)
    var = jnp.mean((x - mean) ** 2, axis=(0, 2, 3), keepdims=True)
    xn = (x - mean) * jax.lax.rsqrt(var + eps)
    xn = xn * gamma.reshape(1, -1, 1, 1) + beta.reshape(1, -1, 1, 1)
    z = jnp.maximum(xn, 0.0)
    w2d = conv_w.reshape(conv_w.shape[0], conv_w.shape[1])
    y = jnp.einsum("nchw,oc->nohw", z, w2d)
    n, o, h, w = y.shape
    return y.reshape(n, o, h // 2, 2, w // 2, 2).mean(axis=(3, 5))


if __name__ == "__main__":
    key = jax.random.PRNGKey(0)
    N, C_in, H, W = 2, 8, 16, 16
    C_out = 4

    kx, kw = jax.random.split(key)
    x = jax.random.normal(kx, (N, C_in, H, W), dtype=jnp.float32)
    conv_w = 0.1 * jax.random.normal(kw, (C_out, C_in, 1, 1), dtype=jnp.float32)
    gamma = jnp.ones((C_in,), jnp.float32)   # BatchNorm2d default init
    beta = jnp.zeros((C_in,), jnp.float32)

    # f32 path (PyTorch-parity check).
    out = jax.block_until_ready(transition_forward(x, gamma, beta, conv_w))
    ref = _reference(x, gamma, beta, conv_w)
    assert out.shape == (N, C_out, H // 2, W // 2), out.shape
    assert jnp.allclose(out, ref, atol=1e-4, rtol=1e-4), float(jnp.max(jnp.abs(out - ref)))

    # bf16 HBM-path smoke test (half the activation bytes, bf16 MXU operands).
    x_bf16 = jnp.transpose(x, (0, 2, 3, 1)).astype(jnp.bfloat16)
    out_bf16 = jax.block_until_ready(transition_forward_nhwc(x_bf16, gamma, beta, conv_w))
    ref_bf16 = _reference(jnp.transpose(x_bf16.astype(jnp.float32), (0, 3, 1, 2)),
                          gamma, beta, conv_w)
    assert out_bf16.shape == (N, H // 2, W // 2, C_out), out_bf16.shape
    assert jnp.allclose(out_bf16.astype(jnp.float32),
                        jnp.transpose(ref_bf16, (0, 2, 3, 1)),
                        atol=5e-2, rtol=5e-2)

    print("KERNEL_OK")
</pallas_src>

<mosaic_0001>
module attributes {stable_mosaic.version = 11 : i64} {
  func.func @_stats_kernel(%arg0: i32, %arg1: i32, %arg2: memref<1x16x8x16xf32, #tpu.memory_space<vmem>>, %arg3: memref<1x1x16xf32, #tpu.memory_space<vmem>>, %arg4: memref<1x1x16xf32, #tpu.memory_space<vmem>>) attributes {dimension_semantics = [#tpu.dimension_semantics<parallel>, #tpu.dimension_semantics<arbitrary>], iteration_bounds = array<i64: 2, 1>, scalar_prefetch = 0 : i64, scratch_operands = 0 : i64, tpu.core_type = #tpu.core_type<tc>, window_params = [{transform_indices = @transform_0, window_bounds = array<i64: 1, 16, 8, 16>}, {transform_indices = @transform_1, window_bounds = array<i64: 1, 1, 16>}, {transform_indices = @transform_2, window_bounds = array<i64: 1, 1, 16>}]} {
    %c0_i32 = arith.constant 0 : i32
    %0 = arith.cmpi eq, %arg1, %c0_i32 : i32
    %1 = arith.extui %0 : i1 to i32
    %c0_i32_0 = arith.constant 0 : i32
    %2 = arith.cmpi ne, %1, %c0_i32_0 : i32
    scf.if %2 {
      %cst_17 = arith.constant 0.000000e+00 : f32
      %18 = vector.broadcast %cst_17 : f32 to vector<1x1x16xf32>
      %c0_18 = arith.constant 0 : index
      %c0_19 = arith.constant 0 : index
      %c0_20 = arith.constant 0 : index
      %19 = vector.load %arg3[%c0_18, %c0_19, %c0_20] : memref<1x1x16xf32, #tpu.memory_space<vmem>>, vector<1x1x16xf32>
      tpu.vector_store %arg3[%c0_18, %c0_19, %c0_20], %18 {strides = array<i32>} : memref<1x1x16xf32, #tpu.memory_space<vmem>>, vector<1x1x16xf32>,
      %cst_21 = arith.constant 0.000000e+00 : f32
      %20 = vector.broadcast %cst_21 : f32 to vector<1x1x16xf32>
      %c0_22 = arith.constant 0 : index
      %c0_23 = arith.constant 0 : index
      %c0_24 = arith.constant 0 : index
      %21 = vector.load %arg4[%c0_22, %c0_23, %c0_24] : memref<1x1x16xf32, #tpu.memory_space<vmem>>, vector<1x1x16xf32>
      tpu.vector_store %arg4[%c0_22, %c0_23, %c0_24], %20 {strides = array<i32>} : memref<1x1x16xf32, #tpu.memory_space<vmem>>, vector<1x1x16xf32>,
    } else {
    }
    %c0 = arith.constant 0 : index
    %c0_1 = arith.constant 0 : index
    %c0_2 = arith.constant 0 : index
    %c0_3 = arith.constant 0 : index
    %3 = vector.load %arg2[%c0, %c0_1, %c0_2, %c0_3] : memref<1x16x8x16xf32, #tpu.memory_space<vmem>>, vector<1x16x8x16xf32>
    %4 = vector.shape_cast %3 : vector<1x16x8x16xf32> to vector<128x16xf32>
    %c0_4 = arith.constant 0 : index
    %c0_5 = arith.constant 0 : index
    %c0_6 = arith.constant 0 : index
    %5 = vector.load %arg3[%c0_4, %c0_5, %c0_6] : memref<1x1x16xf32, #tpu.memory_space<vmem>>, vector<1x1x16xf32>
    %cst = arith.constant dense<0.000000e+00> : vector<16xf32>
    %6 = vector.multi_reduction <add>, %4, %cst [0] : vector<128x16xf32> to vector<16xf32>
    %7 = vector.shape_cast %6 : vector<16xf32> to vector<1x16xf32>
    %8 = vector.shape_cast %7 : vector<1x16xf32> to vector<1x1x16xf32>
    %9 = arith.addf %5, %8 : vector<1x1x16xf32>
    %c0_7 = arith.constant 0 : index
    %c0_8 = arith.constant 0 : index
    %c0_9 = arith.constant 0 : index
    %10 = vector.load %arg3[%c0_7, %c0_8, %c0_9] : memref<1x1x16xf32, #tpu.memory_space<vmem>>, vector<1x1x16xf32>
    tpu.vector_store %arg3[%c0_7, %c0_8, %c0_9], %9 {strides = array<i32>} : memref<1x1x16xf32, #tpu.memory_space<vmem>>, vector<1x1x16xf32>,
    %c0_10 = arith.constant 0 : index
    %c0_11 = arith.constant 0 : index
    %c0_12 = arith.constant 0 : index
    %11 = vector.load %arg4[%c0_10, %c0_11, %c0_12] : memref<1x1x16xf32, #tpu.memory_space<vmem>>, vector<1x1x16xf32>
    %12 = arith.mulf %4, %4 : vector<128x16xf32>
    %cst_13 = arith.constant dense<0.000000e+00> : vector<16xf32>
    %13 = vector.multi_reduction <add>, %12, %cst_13 [0] : vector<128x16xf32> to vector<16xf32>
    %14 = vector.shape_cast %13 : vector<16xf32> to vector<1x16xf32>
    %15 = vector.shape_cast %14 : vector<1x16xf32> to vector<1x1x16xf32>
    %16 = arith.addf %11, %15 : vector<1x1x16xf32>
    %c0_14 = arith.constant 0 : index
    %c0_15 = arith.constant 0 : index
    %c0_16 = arith.constant 0 : index
    %17 = vector.load %arg4[%c0_14, %c0_15, %c0_16] : memref<1x1x16xf32, #tpu.memory_space<vmem>>, vector<1x1x16xf32>
    tpu.vector_store %arg4[%c0_14, %c0_15, %c0_16], %16 {strides = array<i32>} : memref<1x1x16xf32, #tpu.memory_space<vmem>>, vector<1x1x16xf32>,
    return
  }
  func.func @transform_0(%arg0: i32, %arg1: i32) -> (i32, i32, i32, i32) {
    %c0_i32 = arith.constant 0 : i32
    %c0_i32_0 = arith.constant 0 : i32
    %c0_i32_1 = arith.constant 0 : i32
    return %arg0, %arg1, %c0_i32, %c0_i32_0 : i32, i32, i32, i32
  }
  func.func @transform_1(%arg0: i32, %arg1: i32) -> (i32, i32, i32) {
    %c0_i32 = arith.constant 0 : i32
    %c0_i32_0 = arith.constant 0 : i32
    %c0_i32_1 = arith.constant 0 : i32
    return %arg0, %c0_i32, %c0_i32_0 : i32, i32, i32
  }
  func.func @transform_2(%arg0: i32, %arg1: i32) -> (i32, i32, i32) {
    %c0_i32 = arith.constant 0 : i32
    %c0_i32_0 = arith.constant 0 : i32
    %c0_i32_1 = arith.constant 0 : i32
    return %arg0, %c0_i32, %c0_i32_0 : i32, i32, i32
  }
}

</mosaic_0001>

<bundles_post_ra>
// kernel: tpu_custom_call.1
= control target key start
LH: loop header
LB: loop body
LE: loop exit
PB: predicated region body
PF: predicated region fallthrough
CT: control target
= control target key end

     0   :  { %8 = vsyncpa [#allocation3], 0  ;;  %s969_s0 = inlined_call_operand.hbm [shape: f32[2,16,8,16], index: 0, kind: input, shape index: {}]   ;;  %s970_s1 = inlined_call_operand.hbm [shape: f32[2,1,16], index: 1, kind: output, shape index: {0}]   ;;  %s971_s2 = inlined_call_operand.hbm [shape: f32[2,1,16], index: 2, kind: output, shape index: {1}]  }
   0x1   :  { %10 = vsyncpa [#allocation3 + $0x1], 0 }
   0x2   :  { %11 = vsyncpa [#allocation4], 0 }
   0x3   :  { %13 = vsyncpa [#allocation4 + $0x1], 0 }
   0x4   :  { %14 = vsyncpa [#allocation7], 0 }
   0x5   :  { %16 = vsyncpa [#allocation7 + $0x1], 0  ;;  %s695_s9 = smov 0   ;;  %s697_s10 = smov 0  }
   0x6   :  { %s699_s11 = smov 0   ;;  %s701_s12 = smov 0  }
   0x7   :  { %s703_s13 = smov 0   ;;  %s705_s14 = smov 0  }
   0x8 LB: > { %s444_s15 = sadd.s32 4294967295, %s672_s14   ;;  %s445_s16 = sadd.s32 4294967294, %s672_s14   ;;  %s672_s14 = sphi %s705_s14, %s22_s14   ;;  %s668_s13 = sphi %s703_s13, %s986_s13   ;;  %s664_s12 = sphi %s701_s12, %s985_s12   ;;  %s660_s11 = sphi %s699_s11, %s984_s11   ;;  %s656_s10 = sphi %s697_s10, %s983_s10   ;;  %s652_s9 = sphi %s695_s9, %s982_s9  }
   0x9   : > { %s34_s17 = sadd.s32 1, %s668_s13  ;;  %s43_s18 = sadd.s32 1, %s660_s11 }
   0xa   : > { %p36_p0 = scmp.ge.s32.totalorder %s34_s17, 2  ;;  %p50_p1 = scmp.ne.s32.totalorder %s660_s11, %s656_s10 }
   0xb   : > { %p51_p2 = scmp.eq.s32.totalorder %s672_s14, 0  ;;  %p56_p3 = scmp.ne.s32.totalorder %s656_s10, %s652_s9 }
   0xc   : > { %s988_s17 = smov (%p36_p0, %s34_s17), 0  ;;  %p57_p5 = scmp.eq.s32.totalorder %s444_s15, 0 }
   0xd   : > { %p736_p4 = por %p51_p2, %p50_p1  ;;  %s38_s20 = ssub.s32 %s668_s13, %s988_s17 }
   0xe   : > { %p80_p6 = scmp.eq.s32.totalorder %s444_s15, 1  ;;  %p41_p7 = scmp.eq.s32.totalorder %s38_s20, 0 }
   0xf   : > { %p742_p8 = por %p57_p5, %p56_p3  ;;  %p86_p10 = scmp.eq.s32.totalorder %s445_s16, 1 }
  0x10   : > { %p746_p9 = por %p80_p6, %p50_p1  ;;  %p475_p13 = scmp.lt.s32.totalorder %s672_s14, 2 }
  0x11   : > { %s751_s23 = scalar_select %p41_p7, %s660_s11, %s43_s18  }
  0x12   : > { %s975_s22 = scalar_select %p746_p9, 1, 0 }
  0x13   : > { %p753_p11 = por %p86_p10, %p56_p3  ;;  %s132_s25 = sand.u32 1, %s660_s11  }
  0x14   : > { %s448_s26 = sshll.u32 %s132_s25, 7  ;;  %s457_s27 = sshll.u32 %s668_s13, 11 }
  0x15   : > { %s976_s24 = scalar_select %p753_p11, 1, 0 }
  0x16   : > { %s764_s30 = scalar_lea.hbm %s969_s0, %s457_s27  ;;  %s136_s3 = scalar_lea.vmem [#allocation2], %s448_s26 }
  0x17   : > { %s145_s4 = sshll.u32 %s136_s3, 4  ;;  %p770_p0 = pnand %p475_p13, %p736_p4  ;;  %s766_s4 = int_to_ptr.vmem [resolvable:$true] %s145_s4 }
  0x18   : > { %s775_s6 = scalar_lea.sflag [#allocation3], %s132_s25  ;;  %s528_s7 = scalar_lea.hbm %s764_s30, 2048 }
  0x19   : > { %p529_p2 = scmp.ne.s32.totalorder %s764_s30, %s528_s7  ;;  %p530_p3 = pneg %p770_p0 }
  0x1a   : > { %s533_s16 = scalar_lea.hbm %s969_s0, 4096  ;;  %p534_p4 = scmp.lt.u32.totalorder %s764_s30, %s969_s0 }
  0x1b   : > { %p531_p5 = pnand %p530_p3, %p529_p2  ;;  %p535_p7 = scmp.lt.u32.totalorder %s533_s16, %s528_s7 }
  0x1c   : > { %p537_p13 = scmp.lt.u32.totalorder %s528_s7, %s764_s30 }
  0x1d   : > { %p532_p6 = pneg %p531_p5  ;;  %p536_p10 = por %p535_p7, %p534_p4 }
  0x1f   : > { %p538_p12 = por %p537_p13, %p536_p10 }
  0x21   : > { %p539_p1 = pnand %p538_p12, %p532_p6 }
  0x23   : > { %542 = shalt.err (!%p539_p1)
}
  0x24   : > { %s543_s20 = scalar_lea.vmem %s766_s4, 2048  ;;  %s674_s25 = smov [#allocation2]  }
  0x25   : > { %p544_p2 = scmp.ne.s32.totalorder %s766_s4, %s543_s20  ;;  %s548_s26 = sshll.u32 %s674_s25, 4  ;;  %s549_s26 = int_to_ptr.vmem [resolvable:$false] %s548_s26 }
  0x26   : > { %s550_s27 = scalar_lea.vmem %s549_s26, 4096  ;;  %p551_p9 = scmp.lt.s32.totalorder %s766_s4, %s549_s26 }
  0x27   : > { %p546_p5 = pnand %p544_p2, %p530_p3  ;;  %p552_p4 = scmp.lt.s32.totalorder %s550_s27, %s543_s20 }
  0x29   : > { %p547_p11 = pneg %p546_p5  ;;  %p553_p7 = por %p552_p4, %p551_p9 }
  0x2b   : > { %p554_p10 = pnand %p553_p7, %p547_p11 }
  0x2d   : > { %557 = shalt.err (!%p554_p10)
}
  0x2e   : > { %s675_s28 = smov 128   ;;  %s676_s29 = smov 8  }
  0x2f   : > { %467 = dma.hbm_to_vmem [thread:$0]  (!%p770_p0), %s764_s30, 2048, %s766_s4, %s775_s6, %s675_s28, %s675_s28, %s676_s29  }
  0x30   : > { %p153_p12 = scmp.lt.s32.totalorder %s672_s14, 3  ;;  %p978_p1 = scmp.ge.s32.totalorder %s672_s14, 1 }
  0x32   : > { %p154_p3 = pnand %p978_p1, %p153_p12 }
  0x33   : > { %s807_s3 = sand.u32 (!%p154_p3), 1, %s656_s10  }
  0x34   : > { %157 = sbr.rel (%p154_p3) target bundleno = 145 (0x91), region = 24  ;;  %s452_s7 = sshll.u32 (!%p154_p3), %s807_s3, 7 }
  0x35   : > { %s160_s8 = scalar_lea.sflag (!%p154_p3), [#allocation3], %s807_s3  ;;  %s811_s15 = scalar_lea.vmem (!%p154_p3), [#allocation2], %s452_s7 }
  0x3b   : > { %639 = dma.done.wait (%p742_p8), %s160_s8, 2048  }
  0x3c   : > { %641 = vsyncadd (%p742_p8), %s160_s8, 4294965248  ;;  %vm192_vm0 = vcmask 122880   ;;  %s818_s30 = scalar_lea.vmem [#allocation5], %s807_s3  ;;  %v677_v0 = vmov 0.0   ;;  %s823_s4 = scalar_lea.vmem [#allocation6], %s807_s3  ;;  %vm212_vm1 = vcmask 130048  }
  0x3d   : > { %193 = vst.msk [vmem:[%s818_s30] sm:$0x1] %vm192_vm0, %v677_v0  ;;  %194 = vst.msk [vmem:[%s823_s4] sm:$0x1] %vm192_vm0, %v677_v0  ;;  %v195_v1 = vld [vmem:[%s811_s15] sm:$0xff]  ;;  %v196_v2 = vld [vmem:[%s811_s15 + $0x8] sm:$0xff] }
  0x3e   : > { %v197_v3 = vld [vmem:[%s811_s15 + $0x10] sm:$0xff]  ;;  %v213_v4 = vsel %vm212_vm1, %v195_v1, 0.0  ;;  %v214_v5 = vsel %vm212_vm1, %v196_v2, 0.0  ;;  %v198_v7 = vld [vmem:[%s811_s15 + $0x18] sm:$0xff]  ;;  %v199_v10 = vld [vmem:[%s811_s15 + $0x20] sm:$0xff]  ;;  %v254_v15 = vmul.f32 %v195_v1, %v195_v1  ;;  %v255_v16 = vmul.f32 %v196_v2, %v196_v2  ;;  %s453_s21 = sshll.u32 %s664_s12, 4 }
  0x3f   : > { %v216_v6 = vsel %vm212_vm1, %v197_v3, 0.0  ;;  %v215_v8 = vadd.f32 %v214_v5, %v213_v4  ;;  %v218_v9 = vsel %vm212_vm1, %v198_v7, 0.0  ;;  %v220_v12 = vsel %vm212_vm1, %v199_v10, 0.0  ;;  %v200_v13 = vld [vmem:[%s811_s15 + $0x28] sm:$0xff]  ;;  %v201_v19 = vld [vmem:[%s811_s15 + $0x30] sm:$0xff]  ;;  %v202_v24 = vld [vmem:[%s811_s15 + $0x38] sm:$0xff]  ;;  %s883_s18 = scalar_lea.hbm %s970_s1, %s453_s21 }
  0x40   : > { %v256_v17 = vmul.f32 %v197_v3, %v197_v3  ;;  %v222_v18 = vsel %vm212_vm1, %v200_v13, 0.0  ;;  %v257_v21 = vmul.f32 %v198_v7, %v198_v7  ;;  %v224_v22 = vsel %vm212_vm1, %v201_v19, 0.0  ;;  %v203_v31 = vld [vmem:[%s811_s15 + $0x40] sm:$0xff]  ;;  %v204_v37 = vld [vmem:[%s811_s15 + $0x48] sm:$0xff]  ;;  %v205_v43 = vld [vmem:[%s811_s15 + $0x50] sm:$0xff]  ;;  %s326_s5 = sshll.u32 %s818_s30, 4  ;;  %s885_s5 = int_to_ptr.vmem [resolvable:$true] %s326_s5 }
  0x41   : > { %v217_v11 = vadd.f32 %v216_v6, %v215_v8  ;;  %v258_v23 = vmul.f32 %v199_v10, %v199_v10  ;;  %v270_v26 = vsel %vm212_vm1, %v254_v15, 0.0  ;;  %v271_v27 = vsel %vm212_vm1, %v255_v16, 0.0  ;;  %v206_v49 = vld [vmem:[%s811_s15 + $0x58] sm:$0xff]  ;;  %v207_v55 = vld [vmem:[%s811_s15 + $0x60] sm:$0xff]  ;;  %v208_v61 = vld [vmem:[%s811_s15 + $0x68] sm:$0xff]  ;;  %s310_s19 = scalar_lea.sflag [#allocation4], %s807_s3 }
  0x42   : > { %v273_v28 = vsel %vm212_vm1, %v256_v17, 0.0  ;;  %v226_v29 = vsel %vm212_vm1, %v202_v24, 0.0  ;;  %v272_v30 = vadd.f32 %v271_v27, %v270_v26  ;;  %v259_v33 = vmul.f32 %v200_v13, %v200_v13  ;;  %v209_v3 = vld [vmem:[%s811_s15 + $0x70] sm:$0xff]  ;;  %s558_s20 = scalar_lea.vmem %s885_s5, 16  ;;  %p979_p9 = scmp.ne.s32.totalorder %s975_s22, 0 }
  0x43   : > { %v219_v14 = vadd.f32 %v218_v9, %v217_v11  ;;  %v275_v34 = vsel %vm212_vm1, %v257_v21, 0.0  ;;  %v228_v35 = vsel %vm212_vm1, %v203_v31, 0.0  ;;  %v260_v39 = vmul.f32 %v201_v19, %v201_v19  ;;  %v210_v9 = vld [vmem:[%s811_s15 + $0x78] sm:$0xff]  ;;  %p559_p8 = scmp.ne.s32.totalorder %s885_s5, %s558_s20  ;;  %s678_s25 = smov [#allocation5]  }
  0x44   : > { %v274_v36 = vadd.f32 %v273_v28, %v272_v30  ;;  %v277_v40 = vsel %vm212_vm1, %v258_v23, 0.0  ;;  %v230_v41 = vsel %vm212_vm1, %v204_v37, 0.0  ;;  %v261_v45 = vmul.f32 %v202_v24, %v202_v24  ;;  %s562_s26 = sshll.u32 %s678_s25, 4  ;;  %s563_s26 = int_to_ptr.vmem [resolvable:$false] %s562_s26 }
  0x45   : > { %v221_v20 = vadd.f32 %v220_v12, %v219_v14  ;;  %v279_v46 = vsel %vm212_vm1, %v259_v33, 0.0  ;;  %v232_v47 = vsel %vm212_vm1, %v205_v43, 0.0  ;;  %v262_v51 = vmul.f32 %v203_v31, %v203_v31  ;;  %p560_p11 = pnand %p559_p8, %p979_p9  ;;  %s564_s27 = scalar_lea.vmem %s563_s26, 32 }
  0x46   : > { %v276_v42 = vadd.f32 %v275_v34, %v274_v36  ;;  %v281_v52 = vsel %vm212_vm1, %v260_v39, 0.0  ;;  %v234_v53 = vsel %vm212_vm1, %v206_v49, 0.0  ;;  %v263_v57 = vmul.f32 %v204_v37, %v204_v37  ;;  %v211_v36 = vld [vmem:[%s818_s30] sm:$0x1]  ;;  %p565_p6 = scmp.lt.s32.totalorder %s885_s5, %s563_s26  ;;  %p566_p13 = scmp.lt.s32.totalorder %s564_s27, %s558_s20 }
  0x47   : > { %v223_v25 = vadd.f32 %v222_v18, %v221_v20  ;;  %v283_v58 = vsel %vm212_vm1, %v261_v45, 0.0  ;;  %v236_v59 = vsel %vm212_vm1, %v207_v55, 0.0  ;;  %v264_v63 = vmul.f32 %v205_v43, %v205_v43  ;;  %p561_p0 = pneg %p560_p11 }
  0x48   : > { %v278_v48 = vadd.f32 %v277_v40, %v276_v42  ;;  %v285_v0 = vsel %vm212_vm1, %v262_v51, 0.0  ;;  %v238_v1 = vsel %vm212_vm1, %v208_v61, 0.0  ;;  %v265_v5 = vmul.f32 %v206_v49, %v206_v49  ;;  %p567_p2 = por %p566_p13, %p565_p6 }
  0x49   : > { %v225_v32 = vadd.f32 %v224_v22, %v223_v25  ;;  %v287_v6 = vsel %vm212_vm1, %v263_v57, 0.0  ;;  %v240_v7 = vsel %vm212_vm1, %v209_v3, 0.0  ;;  %v266_v11 = vmul.f32 %v207_v55, %v207_v55 }
  0x4a   : > { %v280_v54 = vadd.f32 %v279_v46, %v278_v48  ;;  %v289_v12 = vsel %vm212_vm1, %v264_v63, 0.0  ;;  %v242_v13 = vsel %vm212_vm1, %v210_v9, 0.0  ;;  %v267_v16 = vmul.f32 %v208_v61, %v208_v61  ;;  %p568_p5 = pnand %p567_p2, %p561_p0 }
  0x4b   : > { %v227_v38 = vadd.f32 %v226_v29, %v225_v32  ;;  %v291_v17 = vsel %vm212_vm1, %v265_v5, 0.0  ;;  %v268_v20 = vmul.f32 %v209_v3, %v209_v3  ;;  %v293_v21 = vsel %vm212_vm1, %v266_v11, 0.0 }
  0x4c   : > { %v282_v60 = vadd.f32 %v281_v52, %v280_v54  ;;  %v269_v24 = vmul.f32 %v210_v9, %v210_v9  ;;  %v295_v25 = vsel %vm212_vm1, %v267_v16, 0.0 }
  0x4d   : > { %v229_v44 = vadd.f32 %v228_v35, %v227_v38  ;;  %v297_v28 = vsel %vm212_vm1, %v268_v20, 0.0 }
  0x4e   : > { %v284_v2 = vadd.f32 %v283_v58, %v282_v60  ;;  %v299_v31 = vsel %vm212_vm1, %v269_v24, 0.0 }
  0x4f   : > { %v231_v50 = vadd.f32 %v230_v41, %v229_v44 }
  0x50   : > { %v286_v8 = vadd.f32 %v285_v0, %v284_v2 }
  0x51   : > { %v233_v56 = vadd.f32 %v232_v47, %v231_v50 }
  0x52   : > { %v288_v14 = vadd.f32 %v287_v6, %v286_v8 }
  0x53   : > { %v235_v62 = vadd.f32 %v234_v53, %v233_v56 }
  0x54   : > { %v290_v18 = vadd.f32 %v289_v12, %v288_v14 }
  0x55   : > { %v237_v4 = vadd.f32 %v236_v59, %v235_v62 }
  0x56   : > { %v292_v22 = vadd.f32 %v291_v17, %v290_v18 }
  0x57   : > { %v239_v10 = vadd.f32 %v238_v1, %v237_v4 }
  0x58   : > { %v294_v26 = vadd.f32 %v293_v21, %v292_v22 }
  0x59   : > { %v241_v15 = vadd.f32 %v240_v7, %v239_v10 }
  0x5a   : > { %v296_v29 = vadd.f32 %v295_v25, %v294_v26 }
  0x5b   : > { %v243_v19 = vadd.f32 %v242_v13, %v241_v15 }
  0x5c   : > { %v298_v32 = vadd.f32 %v297_v28, %v296_v29 }
  0x5d   : > { %v244_v23 = vrot.slane %v243_v19, 4 }
  0x5e   : > { %v300_v34 = vadd.f32 %v299_v31, %v298_v32 }
  0x5f   : > { %v245_v27 = vadd.f32 %v244_v23, %v243_v19 }
  0x60   : > { %v301_v37 = vrot.slane %v300_v34, 4 }
  0x61   : > { %v246_v30 = vrot.slane %v245_v27, 2 }
  0x62   : > { %v302_v39 = vadd.f32 %v301_v37, %v300_v34 }
  0x63   : > { %v247_v33 = vadd.f32 %v246_v30, %v245_v27 }
  0x64   : > { %v303_v41 = vrot.slane %v302_v39, 2 }
  0x65   : > { %v248_v35 = vrot.slane %v247_v33, 1 }
  0x66   : > { %v304_v42 = vadd.f32 %v303_v41, %v302_v39 }
  0x67   : > { %v249_v38 = vadd.f32 %v248_v35, %v247_v33 }
  0x69   : > { %v250_v40 = vadd.f32 %v249_v38, %v211_v36 }
  0x6b   : > { %252 = vst.msk [vmem:[%s818_s30] sm:$0x1] %vm192_vm0, %v250_v40 }
  0x6c   : > { %571 = shalt.err (!%p568_p5)
}
  0x6d   : > { %s572_s28 = scalar_lea.hbm %s883_s18, 16  ;;  %s576_s8 = scalar_lea.hbm %s970_s1, 32 }
  0x6e   : > { %p573_p4 = scmp.ne.s32.totalorder %s883_s18, %s572_s28  ;;  %p577_p12 = scmp.lt.u32.totalorder %s883_s18, %s970_s1 }
  0x6f   : > { %p578_p1 = scmp.lt.u32.totalorder %s576_s8, %s572_s28  ;;  %p580_p8 = scmp.lt.u32.totalorder %s572_s28, %s883_s18 }
  0x70   : > { %p574_p7 = pnand %p573_p4, %p979_p9 }
  0x71   : > { %p579_p3 = por %p578_p1, %p577_p12 }
  0x72   : > { %p575_p10 = pneg %p574_p7 }
  0x73   : > { %p581_p11 = por %p580_p8, %p579_p3 }
  0x75   : > { %p582_p0 = pnand %p581_p11, %p575_p10 }
  0x77   : > { %585 = shalt.err (!%p582_p0)
}
  0x78   : > { %460 = dma.vmem_to_hbm [thread:$0]  (%p979_p9), %s885_s5, 16, %s883_s18, %s310_s19   ;;  %v305_v43 = vrot.slane %v304_v42, 1  ;;  %v253_v44 = vld [vmem:[%s823_s4] sm:$0x1] }
  0x79   : > { %s339_s6 = sshll.u32 %s823_s4, 4  ;;  %s918_s25 = scalar_lea.hbm %s971_s2, %s453_s21  ;;  %s920_s6 = int_to_ptr.vmem [resolvable:$true] %s339_s6 }
  0x7a   : > { %v306_v45 = vadd.f32 %v305_v43, %v304_v42  ;;  %s314_s26 = scalar_lea.sflag [#allocation7], %s807_s3  ;;  %s586_s5 = scalar_lea.vmem %s920_s6, 16 }
  0x7b   : > { %p587_p6 = scmp.ne.s32.totalorder %s920_s6, %s586_s5  ;;  %s679_s18 = smov [#allocation6]  }
  0x7c   : > { %v307_v46 = vadd.f32 %v306_v45, %v253_v44  ;;  %s590_s12 = sshll.u32 %s679_s18, 4  ;;  %s591_s12 = int_to_ptr.vmem [resolvable:$false] %s590_s12 }
  0x7d   : > { %p588_p13 = pnand %p587_p6, %p979_p9  ;;  %s592_s19 = scalar_lea.vmem %s591_s12, 32 }
  0x7e   : > { %308 = vst.msk [vmem:[%s823_s4] sm:$0x1] %vm192_vm0, %v307_v46  ;;  %p593_p5 = scmp.lt.s32.totalorder %s920_s6, %s591_s12  ;;  %p594_p4 = scmp.lt.s32.totalorder %s592_s19, %s586_s5 }
  0x7f   : > { %p589_p2 = pneg %p588_p13 }
  0x80   : > { %p595_p7 = por %p594_p4, %p593_p5 }
  0x82   : > { %p596_p10 = pnand %p595_p7, %p589_p2 }
  0x84   : > { %599 = shalt.err (!%p596_p10)
}
  0x85   : > { %s600_s3 = scalar_lea.hbm %s918_s25, 16  ;;  %s604_s27 = scalar_lea.hbm %s971_s2, 32 }
  0x86   : > { %p601_p12 = scmp.ne.s32.totalorder %s918_s25, %s600_s3  ;;  %p605_p8 = scmp.lt.u32.totalorder %s918_s25, %s971_s2 }
  0x87   : > { %p606_p11 = scmp.lt.u32.totalorder %s604_s27, %s600_s3  ;;  %p608_p6 = scmp.lt.u32.totalorder %s600_s3, %s918_s25 }
  0x88   : > { %p602_p1 = pnand %p601_p12, %p979_p9 }
  0x89   : > { %p607_p0 = por %p606_p11, %p605_p8 }
  0x8a   : > { %p603_p3 = pneg %p602_p1 }
  0x8b   : > { %p609_p13 = por %p608_p6, %p607_p0 }
  0x8d   : > { %p610_p2 = pnand %p609_p13, %p603_p3 }
  0x8f   : > { %613 = shalt.err (!%p610_p2)
}
  0x90   : > { %461 = dma.vmem_to_hbm [thread:$0]  (%p979_p9), %s920_s6, 16, %s918_s25, %s314_s26  }
  0x91 PF: > { %s351_s7 = sand.u32 1, %s652_s9   ;;  %p980_p5 = scmp.ne.s32.totalorder %s976_s24, 0 }
  0x92   : > { %p981_p4 = scmp.ge.s32.totalorder %s672_s14, 2  ;;  %s352_s8 = scalar_lea.sflag [#allocation4], %s351_s7 }
  0x94   : > { %p469_p7 = pnand %p981_p4, %p980_p5 }
  0x96   : > { %643 = dma.done.wait (!%p469_p7), %s352_s8, 16  }
  0x97   : > { %645 = vsyncadd (!%p469_p7), %s352_s8, 4294967280  ;;  %s360_s15 = scalar_lea.sflag [#allocation7], %s351_s7 }
  0x98   : > { %647 = dma.done.wait (!%p469_p7), %s360_s15, 16  }
  0x99   : > { %649 = vsyncadd (!%p469_p7), %s360_s15, 4294967280  ;;  %s22_s14 = sadd.s32 1, %s672_s14   ;;  %s982_s9 = smov %s656_s10 }
  0x9a   : > { %p19_p10 = scmp.ge.s32.totalorder %s22_s14, 4   ;;  %s983_s10 = smov %s660_s11 }
  0x9b   : > { %s984_s11 = smov %s751_s23  ;;  %s985_s12 = smov %s668_s13 }
  0x9c   : > { %s986_s13 = smov %s988_s17  ;;  %21 = sbr.rel (!%p19_p10) target bundleno = 8 (0x8), region = 90 }
  0xa3   :  { %364 = vsyncpa [#allocation3], 1 }
  0xa4   :  { %366 = vsyncpa [#allocation3 + $0x1], 1 }
  0xa5   :  { %367 = vsyncpa [#allocation4], 1 }
  0xa6   :  { %369 = vsyncpa [#allocation4 + $0x1], 1 }
  0xa7   :  { %370 = vsyncpa [#allocation7], 1 }
  0xa8   :  { %372 = vsyncpa [#allocation7 + $0x1], 1 }

</bundles_post_ra>
